<compile_context>
chip_gen: v5e
topology: v5e:2x2
jax: 0.10.0
libtpu: 0.0.40
codegen_flags: <defaults>
</compile_context>

<pallas_src>
import jax
import jax.numpy as jnp
from jax.experimental import pallas as pl
from jax.experimental.pallas import tpu as pltpu


def _round_up(v, m):
    return ((v + m - 1) // m) * m


def _vmem_capacity_bytes():
    try:
        return int(pltpu.get_tpu_info().vmem_capacity_bytes)
    except Exception:
        return 64 << 20  # conservative default: v7x per-TensorCore VMEM


def _make_kernel(epilogue_dtype):
    epilogue_dtype = jnp.dtype(epilogue_dtype)

    def kernel(x_ref, w_ref, b_ref, o_ref):
        # NOTE: when B % tm != 0 the last tile touches out-of-bounds rows of x.
        # Everything below is per-row elementwise (no cross-row reductions) and
        # the clipped store discards those rows, so garbage there cannot leak.
        x = x_ref[...].astype(w_ref.dtype)  # in-kernel cast to MXU dtype (VPU, hidden)
        y = jnp.dot(x, w_ref[...], preferred_element_type=jnp.float32)
        y = y + b_ref[...]
        if epilogue_dtype != jnp.dtype(jnp.float32):
            y = y.astype(epilogue_dtype)    # bf16 EUP tanh on v6e / v7x
        o_ref[...] = jnp.tanh(y).astype(o_ref.dtype)

    return kernel


def prepare_interaction_weight_params(w, b, *, mxu_dtype=jnp.bfloat16):
    """One-time parameter transform (hoist out of the per-call path).

    w: (in_size*out_size, topo_emb)   PyTorch nn.Linear weight layout
    b: (in_size*out_size,)
    Returns (w_t, b2) pre-transposed / pre-cast operands for the kernel.
    Do this once at model setup (or under the caller's jit so it constant-folds
    on the frozen parameters).

    mxu_dtype=jnp.float32 gives full f32 parity with PyTorch (slower MXU path);
    the bf16 default deviates at the ~1e-2 level, acceptable for inference.
    """
    output_size, topo_emb = w.shape
    assert b.shape == (output_size,)
    w_t = jnp.transpose(w).astype(mxu_dtype)             # (topo_emb, output_size)
    b2 = b.reshape(1, output_size).astype(jnp.float32)   # f32 epilogue bias
    return w_t, b2


# Memoized: whether this jax build accepts pl.Buffered(1) on resident inputs.
_SINGLE_BUFFER_RESIDENT_OK = [True]


def _build_pallas_call(tm, B, K, N, out_dtype, epilogue_dtype,
                       vmem_limit_bytes, cost, single_buffer_resident):
    resident_kwargs = {}
    if single_buffer_resident and hasattr(pl, "Buffered"):
        # Weight/bias index_map is constant; default 2-deep pipelining would
        # only duplicate them in VMEM.
        resident_kwargs = dict(pipeline_mode=pl.Buffered(1))

    return pl.pallas_call(
        _make_kernel(epilogue_dtype),
        out_shape=jax.ShapeDtypeStruct((B, N), out_dtype),
        grid=(pl.cdiv(B, tm),),
        in_specs=[
            pl.BlockSpec((tm, K), lambda i: (i, 0)),                    # x tile (double-buffered)
            pl.BlockSpec((K, N), lambda i: (0, 0), **resident_kwargs),  # W_t resident
            pl.BlockSpec((1, N), lambda i: (0, 0), **resident_kwargs),  # bias resident
        ],
        out_specs=pl.BlockSpec((tm, N), lambda i: (i, 0)),
        compiler_params=pltpu.CompilerParams(
            dimension_semantics=("parallel",),   # v7x: shard batch over its 2 TCs
            vmem_limit_bytes=vmem_limit_bytes,
        ),
        cost_estimate=cost,
    )


def interaction_weight_apply(x, w_t, b2, in_size, out_size, *,
                             out_dtype=None, block_b=512, bf16_epilogue=False):
    """tanh(x @ W_t + b) reshaped to (B, in_size, out_size).

    x:   (B, topo_emb)
    w_t: (topo_emb, in_size*out_size)  from prepare_interaction_weight_params
    b2:  (1, in_size*out_size)         f32
    out_dtype: None -> x.dtype. Pass jnp.bfloat16 to halve output HBM traffic
               (this kernel is store-bound) when downstream tolerates it.
    bf16_epilogue: run bias-add + tanh in bf16 (v6e/v7x have bf16 VPU/EUP);
               keep False on v5e.
    """
    B, K = x.shape
    K_w, N = w_t.shape
    assert K_w == K
    assert N == in_size * out_size
    assert b2.shape == (1, N)

    out_dtype = jnp.dtype(x.dtype if out_dtype is None else out_dtype)
    epilogue_dtype = jnp.bfloat16 if bf16_epilogue else jnp.float32

    # ---- batch-tile selection from an explicit VMEM budget -----------------
    x_item = jnp.dtype(x.dtype).itemsize
    w_item = jnp.dtype(w_t.dtype).itemsize
    o_item = out_dtype.itemsize
    K_r = _round_up(K, 8)
    N_r = _round_up(N, 128)

    def footprint(tm):
        tm_r = _round_up(tm, 8)
        return (2 * tm_r * K_r * x_item      # x tiles: double-buffered
                + K_r * N_r * w_item         # weight: resident, single-buffered
                + 8 * N_r * 4                # bias: resident (one (8,128) f32 tile)
                + 2 * tm_r * N_r * o_item)   # output tiles: double-buffered

    if B <= 8:
        tm = B  # single full-batch block (block dim == array dim is always legal)
    else:
        # >= 2 grid steps so v7x's two TensorCores both get work.
        tm = min(block_b, _round_up(pl.cdiv(B, 2), 8))

    vmem_cap = _vmem_capacity_bytes()
    budget = int(0.6 * vmem_cap)  # headroom for compiler scratch
    while tm > 8 and footprint(tm) > budget:
        tm = max(8, _round_up(tm // 2, 8))
    vmem_limit = int(min(vmem_cap, max(32 << 20, int(1.25 * footprint(tm)))))

    cost = pl.CostEstimate(
        flops=2 * B * K * N,
        transcendentals=B * N,
        bytes_accessed=B * K * x_item + K * N * w_item + N * 4 + B * N * o_item,
    )

    args = (x, w_t, b2)
    try:
        call = _build_pallas_call(tm, B, K, N, out_dtype, epilogue_dtype,
                                  vmem_limit, cost,
                                  single_buffer_resident=_SINGLE_BUFFER_RESIDENT_OK[0])
        y = call(*args)
    except Exception:
        if not _SINGLE_BUFFER_RESIDENT_OK[0]:
            raise
        # This jax build rejected pl.Buffered(1); fall back to default buffering.
        _SINGLE_BUFFER_RESIDENT_OK[0] = False
        call = _build_pallas_call(tm, B, K, N, out_dtype, epilogue_dtype,
                                  vmem_limit, cost, single_buffer_resident=False)
        y = call(*args)

    # Glue: reshape to (B, in_size, out_size), matching torch.reshape.
    return y.reshape(B, in_size, out_size)


def interaction_weight(x, w, b, in_size, out_size, *, mxu_dtype=jnp.bfloat16, **kwargs):
    """Convenience one-shot: prepare + apply.

    For repeated calls, hoist prepare_interaction_weight_params out of the hot
    path (or jit the caller so the prep constant-folds on frozen parameters).
    """
    w_t, b2 = prepare_interaction_weight_params(w, b, mxu_dtype=mxu_dtype)
    return interaction_weight_apply(x, w_t, b2, in_size, out_size, **kwargs)


if __name__ == "__main__":
    # Small shapes consistent with the module.
    B = 2
    topo_emb_size = 32
    in_size = 8
    out_size = 16
    output_size = in_size * out_size

    key = jax.random.PRNGKey(0)
    kx, kw, kb = jax.random.split(key, 3)

    x = jax.random.normal(kx, (B, topo_emb_size), dtype=jnp.float32)

    # Deterministic Linear params (mimic PyTorch's uniform(-1/sqrt(fan_in), +1/sqrt(fan_in))).
    bound = 1.0 / jnp.sqrt(jnp.float32(topo_emb_size))
    # PyTorch stores weight as (output_size, topo_emb_size).
    w = jax.random.uniform(kw, (output_size, topo_emb_size), dtype=jnp.float32,
                           minval=-bound, maxval=bound)
    b = jax.random.uniform(kb, (output_size,), dtype=jnp.float32,
                           minval=-bound, maxval=bound)

    # One-time parameter prep (hoisted out of the per-call hot path).
    w_t, b2 = prepare_interaction_weight_params(w, b)

    weight = interaction_weight_apply(x, w_t, b2, in_size, out_size)
    weight = jax.block_until_ready(weight)

    # Pure-JAX f32 reference check (bf16 MXU operands -> slightly looser tol).
    ref = jnp.tanh(x @ w.T + b).reshape(B, in_size, out_size)
    assert weight.shape == (B, in_size, out_size)
    assert jnp.allclose(weight, ref, atol=2e-2, rtol=2e-2)

    print("KERNEL_OK")
</pallas_src>

<mosaic_0001>
module attributes {stable_mosaic.version = 11 : i64} {
  func.func @kernel(%arg0: i32, %arg1: memref<2x32xf32, #tpu.memory_space<vmem>>, %arg2: memref<32x128xbf16, #tpu.memory_space<vmem>>, %arg3: memref<1x128xf32, #tpu.memory_space<vmem>>, %arg4: memref<2x128xf32, #tpu.memory_space<vmem>>) attributes {dimension_semantics = [#tpu.dimension_semantics<parallel>], iteration_bounds = array<i64: 1>, scalar_prefetch = 0 : i64, scratch_operands = 0 : i64, tpu.core_type = #tpu.core_type<tc>, window_params = [{transform_indices = @transform_0, window_bounds = array<i64: 2, 32>}, {pipeline_mode = #tpu.pipeline_mode<synchronous>, transform_indices = @transform_1, window_bounds = array<i64: 32, 128>}, {pipeline_mode = #tpu.pipeline_mode<synchronous>, transform_indices = @transform_2, window_bounds = array<i64: 1, 128>}, {transform_indices = @transform_3, window_bounds = array<i64: 2, 128>}]} {
    %c0 = arith.constant 0 : index
    %c0_0 = arith.constant 0 : index
    %0 = vector.load %arg1[%c0, %c0_0] : memref<2x32xf32, #tpu.memory_space<vmem>>, vector<2x32xf32>
    %1 = arith.truncf %0 : vector<2x32xf32> to vector<2x32xbf16>
    %c0_1 = arith.constant 0 : index
    %c0_2 = arith.constant 0 : index
    %2 = vector.load %arg2[%c0_1, %c0_2] : memref<32x128xbf16, #tpu.memory_space<vmem>>, vector<32x128xbf16>
    %cst = arith.constant dense<0.000000e+00> : vector<2x128xf32>
    %3 = tpu.matmul %1, %2, %cst {dimension_numbers = #tpu.dot_dimension_numbers<[1], [0], [0], [1], [0, 0, 1, 1], [], []>} : vector<2x32xbf16>, vector<32x128xbf16>, vector<2x128xf32> -> vector<2x128xf32>
    %c0_3 = arith.constant 0 : index
    %c0_4 = arith.constant 0 : index
    %4 = vector.load %arg3[%c0_3, %c0_4] : memref<1x128xf32, #tpu.memory_space<vmem>>, vector<1x128xf32>
    %5 = vector.broadcast %4 : vector<1x128xf32> to vector<2x128xf32>
    %6 = arith.addf %3, %5 : vector<2x128xf32>
    %7 = math.tanh %6 : vector<2x128xf32>
    %c0_5 = arith.constant 0 : index
    %c0_6 = arith.constant 0 : index
    %8 = vector.load %arg4[%c0_5, %c0_6] : memref<2x128xf32, #tpu.memory_space<vmem>>, vector<2x128xf32>
    tpu.vector_store %arg4[%c0_5, %c0_6], %7 {strides = array<i32>} : memref<2x128xf32, #tpu.memory_space<vmem>>, vector<2x128xf32>,
    return
  }
  func.func @transform_0(%arg0: i32) -> (i32, i32) {
    %c0_i32 = arith.constant 0 : i32
    %c0_i32_0 = arith.constant 0 : i32
    return %arg0, %c0_i32 : i32, i32
  }
  func.func @transform_1(%arg0: i32) -> (i32, i32) {
    %c0_i32 = arith.constant 0 : i32
    %c0_i32_0 = arith.constant 0 : i32
    %c0_i32_1 = arith.constant 0 : i32
    return %c0_i32, %c0_i32_0 : i32, i32
  }
  func.func @transform_2(%arg0: i32) -> (i32, i32) {
    %c0_i32 = arith.constant 0 : i32
    %c0_i32_0 = arith.constant 0 : i32
    %c0_i32_1 = arith.constant 0 : i32
    return %c0_i32, %c0_i32_0 : i32, i32
  }
  func.func @transform_3(%arg0: i32) -> (i32, i32) {
    %c0_i32 = arith.constant 0 : i32
    %c0_i32_0 = arith.constant 0 : i32
    return %arg0, %c0_i32 : i32, i32
  }
}

module attributes {stable_mosaic.version = 11 : i64} {
  func.func @kernel(%arg0: i32, %arg1: memref<2x32xf32, #tpu.memory_space<vmem>>, %arg2: memref<32x128xbf16, #tpu.memory_space<vmem>>, %arg3: memref<1x128xf32, #tpu.memory_space<vmem>>, %arg4: memref<2x128xf32, #tpu.memory_space<vmem>>) attributes {dimension_semantics = [#tpu.dimension_semantics<parallel>], iteration_bounds = array<i64: 1>, scalar_prefetch = 0 : i64, scratch_operands = 0 : i64, tpu.core_type = #tpu.core_type<tc>, window_params = [{transform_indices = @transform_0, window_bounds = array<i64: 2, 32>}, {pipeline_mode = #tpu.pipeline_mode<synchronous>, transform_indices = @transform_1, window_bounds = array<i64: 32, 128>}, {pipeline_mode = #tpu.pipeline_mode<synchronous>, transform_indices = @transform_2, window_bounds = array<i64: 1, 128>}, {transform_indices = @transform_3, window_bounds = array<i64: 2, 128>}]} {
    %c0 = arith.constant 0 : index
    %c0_0 = arith.constant 0 : index
    %0 = vector.load %arg1[%c0, %c0_0] : memref<2x32xf32, #tpu.memory_space<vmem>>, vector<2x32xf32>
    %1 = arith.truncf %0 : vector<2x32xf32> to vector<2x32xbf16>
    %c0_1 = arith.constant 0 : index
    %c0_2 = arith.constant 0 : index
    %2 = vector.load %arg2[%c0_1, %c0_2] : memref<32x128xbf16, #tpu.memory_space<vmem>>, vector<32x128xbf16>
    %cst = arith.constant dense<0.000000e+00> : vector<2x128xf32>
    %3 = tpu.matmul %1, %2, %cst {dimension_numbers = #tpu.dot_dimension_numbers<[1], [0], [0], [1], [0, 0, 1, 1], [], []>} : vector<2x32xbf16>, vector<32x128xbf16>, vector<2x128xf32> -> vector<2x128xf32>
    %c0_3 = arith.constant 0 : index
    %c0_4 = arith.constant 0 : index
    %4 = vector.load %arg3[%c0_3, %c0_4] : memref<1x128xf32, #tpu.memory_space<vmem>>, vector<1x128xf32>
    %5 = vector.broadcast %4 : vector<1x128xf32> to vector<2x128xf32>
    %6 = arith.addf %3, %5 : vector<2x128xf32>
    %7 = math.tanh %6 : vector<2x128xf32>
    %c0_5 = arith.constant 0 : index
    %c0_6 = arith.constant 0 : index
    %8 = vector.load %arg4[%c0_5, %c0_6] : memref<2x128xf32, #tpu.memory_space<vmem>>, vector<2x128xf32>
    tpu.vector_store %arg4[%c0_5, %c0_6], %7 {strides = array<i32>} : memref<2x128xf32, #tpu.memory_space<vmem>>, vector<2x128xf32>,
    return
  }
  func.func @transform_0(%arg0: i32) -> (i32, i32) {
    %c0_i32 = arith.constant 0 : i32
    %c0_i32_0 = arith.constant 0 : i32
    return %arg0, %c0_i32 : i32, i32
  }
  func.func @transform_1(%arg0: i32) -> (i32, i32) {
    %c0_i32 = arith.constant 0 : i32
    %c0_i32_0 = arith.constant 0 : i32
    %c0_i32_1 = arith.constant 0 : i32
    return %c0_i32, %c0_i32_0 : i32, i32
  }
  func.func @transform_2(%arg0: i32) -> (i32, i32) {
    %c0_i32 = arith.constant 0 : i32
    %c0_i32_0 = arith.constant 0 : i32
    %c0_i32_1 = arith.constant 0 : i32
    return %c0_i32, %c0_i32_0 : i32, i32
  }
  func.func @transform_3(%arg0: i32) -> (i32, i32) {
    %c0_i32 = arith.constant 0 : i32
    %c0_i32_0 = arith.constant 0 : i32
    return %arg0, %c0_i32 : i32, i32
  }
}

</mosaic_0001>

<bundles_post_ra>
// kernel: tpu_custom_call.1
= control target key start
LH: loop header
LB: loop body
LE: loop exit
PB: predicated region body
PF: predicated region fallthrough
CT: control target
= control target key end

     0   :  { %8 = vsyncpa [#allocation3], 0  ;;  %s239_s0 = inlined_call_operand.hbm [shape: f32[2,32], index: 0, kind: input, shape index: {}]   ;;  %s240_s1 = inlined_call_operand.hbm [shape: bf16[32,128], index: 1, kind: input, shape index: {}]   ;;  %s241_s2 = inlined_call_operand.vmem [shape: f32[1,128], index: 2, kind: input, shape index: {}]   ;;  %s242_s3 = inlined_call_operand.hbm [shape: f32[2,128], index: 3, kind: output, shape index: {}]  }
   0x1   :  { %9 = vsyncpa [#allocation6], 0 }
   0x2   :  { %10 = vsyncpa [#allocation4], 0  ;;  %s16_s14 = sshll.u32 %s239_s0, 4  ;;  %s202_s15 = smov [#allocation2]   ;;  %s17_s14 = int_to_ptr.hbm [resolvable:$true] %s16_s14 }
   0x3   :  { %s18_s16 = sshll.u32 %s202_s15, 4  ;;  %s26_s19 = sshll.u32 %s240_s1, 4  ;;  %s19_s16 = int_to_ptr.vmem [resolvable:$true] %s18_s16  ;;  %s27_s19 = int_to_ptr.hbm [resolvable:$true] %s26_s19 }
   0x4   :  { %21 = dma.hbm_to_vmem [thread:$0]  %s17_s14, 32, %s19_s16, [#allocation3]  }
   0x5   :  { %s203_s20 = smov [#allocation5]   ;;  %s204_s22 = smov 64  }
   0x6   :  { %s28_s21 = sshll.u32 %s203_s20, 4  ;;  %s205_s23 = smov 4   ;;  %s29_s21 = int_to_ptr.vmem [resolvable:$true] %s28_s21 }
   0x7   :  { %34 = dma.hbm_to_vmem [thread:$0]  %s27_s19, 256, %s29_s21, [#allocation6], %s204_s22, %s204_s22, %s205_s23  }
   0x8   :  { %196 = dma.done.wait [#allocation3], 32  }
   0x9   :  { %197 = vsyncadd [#allocation3], 4294967264 }
   0xa   :  { %198 = dma.done.wait [#allocation6], 256  }
   0xb   :  { %199 = vsyncadd [#allocation6], 4294967040  ;;  %v115_v0 = vld [vmem:[#allocation5 + $0x8] sm:$0xff]  ;;  %v114_v1 = vld [vmem:[#allocation5] sm:$0xff]  ;;  %vm68_vm0 = vcmask 261120   ;;  %s206_s24 = smov [#allocation7]  }
   0xc   :  { %78 = vmatpush.bf16.msra.mxu0 %v115_v0  ;;  %v46_v2 = vld [vmem:[#allocation2] sm:$0x3]  ;;  %s92_s25 = sshll.u32 %s206_s24, 4  ;;  %s94_s28 = sshll.u32 %s242_s3, 4  ;;  %s93_s25 = int_to_ptr.vmem [resolvable:$true] %s92_s25  ;;  %s95_s28 = int_to_ptr.hbm [resolvable:$true] %s94_s28 }
   0xd   :  { %v47_v3 = vpack.c.bf16 %v46_v2, %v46_v2  ;;  %v121_v4 = vld [vmem:[%s241_s2] ss:$0 sm:$0xff] }
  0x10   :  { %79 = vmatpush.bf16.msra.mxu0 %v114_v1 }
  0x13   :  { %113 = vmatmul.msk.bf16.vlgmr.msra.gmra.mxu0 %vm68_vm0, %v47_v3 }
  0x90   :  { %v81_v5 = vpop.f32.mrf.mxu0 }
  0x91   :  { %v82_v6 = vadd.f32 %v121_v4, %v81_v5 }
  0x93   :  { %122 = vtanh.f32 %v82_v6 }
  0x98   :  { %v83_v7 = vpop.f32.mrf.mxu0 }
  0x99   :  { %v123_v8 = vpop.eup %122 }
  0x9a   :  { %86 = vst [vmem:[#allocation7] sm:$0x3] %v123_v8 }
  0x9b   :  { %97 = dma.vmem_to_hbm [thread:$0]  %s93_s25, 32, %s95_s28, [#allocation4]  }
  0x9c   :  { %200 = dma.done.wait [#allocation4], 32  }
  0x9d   :  { %201 = vsyncadd [#allocation4], 4294967264 }
  0x9e   :  { %102 = vsyncpa [#allocation3], 1 }
  0x9f   :  { %103 = vsyncpa [#allocation6], 1 }
  0xa0   :  { %104 = vsyncpa [#allocation4], 1 }

// kernel: tpu_custom_call.1
= control target key start
LH: loop header
LB: loop body
LE: loop exit
PB: predicated region body
PF: predicated region fallthrough
CT: control target
= control target key end

     0   :  { %8 = vsyncpa [#allocation3], 0  ;;  %s239_s0 = inlined_call_operand.hbm [shape: f32[2,32], index: 0, kind: input, shape index: {}]   ;;  %s240_s1 = inlined_call_operand.hbm [shape: bf16[32,128], index: 1, kind: input, shape index: {}]   ;;  %s241_s2 = inlined_call_operand.vmem [shape: f32[1,128], index: 2, kind: input, shape index: {}]   ;;  %s242_s3 = inlined_call_operand.hbm [shape: f32[2,128], index: 3, kind: output, shape index: {}]  }
   0x1   :  { %9 = vsyncpa [#allocation6], 0 }
   0x2   :  { %10 = vsyncpa [#allocation4], 0  ;;  %s16_s14 = sshll.u32 %s239_s0, 4  ;;  %s202_s15 = smov [#allocation2]   ;;  %s17_s14 = int_to_ptr.hbm [resolvable:$true] %s16_s14 }
   0x3   :  { %s18_s16 = sshll.u32 %s202_s15, 4  ;;  %s26_s19 = sshll.u32 %s240_s1, 4  ;;  %s19_s16 = int_to_ptr.vmem [resolvable:$true] %s18_s16  ;;  %s27_s19 = int_to_ptr.hbm [resolvable:$true] %s26_s19 }
   0x4   :  { %21 = dma.hbm_to_vmem [thread:$0]  %s17_s14, 32, %s19_s16, [#allocation3]  }
   0x5   :  { %s203_s20 = smov [#allocation5]   ;;  %s204_s22 = smov 64  }
   0x6   :  { %s28_s21 = sshll.u32 %s203_s20, 4  ;;  %s205_s23 = smov 4   ;;  %s29_s21 = int_to_ptr.vmem [resolvable:$true] %s28_s21 }
   0x7   :  { %34 = dma.hbm_to_vmem [thread:$0]  %s27_s19, 256, %s29_s21, [#allocation6], %s204_s22, %s204_s22, %s205_s23  }
   0x8   :  { %196 = dma.done.wait [#allocation3], 32  }
   0x9   :  { %197 = vsyncadd [#allocation3], 4294967264 }
   0xa   :  { %198 = dma.done.wait [#allocation6], 256  }
   0xb   :  { %199 = vsyncadd [#allocation6], 4294967040  ;;  %v115_v0 = vld [vmem:[#allocation5 + $0x8] sm:$0xff]  ;;  %v114_v1 = vld [vmem:[#allocation5] sm:$0xff]  ;;  %vm68_vm0 = vcmask 261120   ;;  %s206_s24 = smov [#allocation7]  }
   0xc   :  { %78 = vmatpush.bf16.msra.mxu0 %v115_v0  ;;  %v46_v2 = vld [vmem:[#allocation2] sm:$0x3]  ;;  %s92_s25 = sshll.u32 %s206_s24, 4  ;;  %s94_s28 = sshll.u32 %s242_s3, 4  ;;  %s93_s25 = int_to_ptr.vmem [resolvable:$true] %s92_s25  ;;  %s95_s28 = int_to_ptr.hbm [resolvable:$true] %s94_s28 }
   0xd   :  { %v47_v3 = vpack.c.bf16 %v46_v2, %v46_v2  ;;  %v121_v4 = vld [vmem:[%s241_s2] ss:$0 sm:$0xff] }
  0x10   :  { %79 = vmatpush.bf16.msra.mxu0 %v114_v1 }
  0x13   :  { %113 = vmatmul.msk.bf16.vlgmr.msra.gmra.mxu0 %vm68_vm0, %v47_v3 }
  0x90   :  { %v81_v5 = vpop.f32.mrf.mxu0 }
  0x91   :  { %v82_v6 = vadd.f32 %v121_v4, %v81_v5 }
  0x93   :  { %122 = vtanh.f32 %v82_v6 }
  0x98   :  { %v83_v7 = vpop.f32.mrf.mxu0 }
  0x99   :  { %v123_v8 = vpop.eup %122 }
  0x9a   :  { %86 = vst [vmem:[#allocation7] sm:$0x3] %v123_v8 }
  0x9b   :  { %97 = dma.vmem_to_hbm [thread:$0]  %s93_s25, 32, %s95_s28, [#allocation4]  }
  0x9c   :  { %200 = dma.done.wait [#allocation4], 32  }
  0x9d   :  { %201 = vsyncadd [#allocation4], 4294967264 }
  0x9e   :  { %102 = vsyncpa [#allocation3], 1 }
  0x9f   :  { %103 = vsyncpa [#allocation6], 1 }
  0xa0   :  { %104 = vsyncpa [#allocation4], 1 }

</bundles_post_ra>
